<compile_context>
chip_gen: v5e
topology: v5e:2x2
jax: 0.10.0
libtpu: 0.0.40
codegen_flags: <defaults>
</compile_context>

<pallas_src>
import functools

import jax
import jax.numpy as jnp
from jax import lax
from jax.experimental import pallas as pl
from jax.experimental.pallas import tpu as pltpu


def eve_kernel(x_ref, w_ref, b_ref, out_ref, *, dims):
    """One batch tile of the Eve forward pass.

    x_ref:   (TM, n_cipher) bf16  -- natural (batch, feature) layout
    w_ref:   (L, Dmax, Dmax) bf16 -- zero-padded weight slab, PyTorch (out, in) order
    b_ref:   (L, Dmax, 1)    f32  -- zero-padded bias slab
    out_ref: (n_plain, TM)   f32  -- lane-dense output (batch on the 128-lane axis)

    Computes  h   = relu(W0 @ x^T + b0)
              h   = relu(h + Wi @ h + bi)   for each hidden residual layer
              out = tanh(Wl @ h + bl)
    The first layer's transpose is fused into the MXU via dot_general.
    """
    num_layers = len(dims)
    x = x_ref[...]  # (TM, n_cipher) bf16

    # First layer: contract W0 dim 1 (in) with x dim 1 (n_cipher) -> (hidden, TM).
    o0, i0 = dims[0]
    w0 = w_ref[0][:o0, :i0]
    b0 = b_ref[0][:o0, :]
    h = jax.nn.relu(
        lax.dot_general(w0, x, (((1,), (1,)), ((), ())),
                        preferred_element_type=jnp.float32)
        + b0
    )

    # Hidden residual layers: ReLU(h + W @ h + b).  Elementwise stays f32 (v5e-safe).
    for i in range(1, num_layers - 1):
        oi, ii = dims[i]
        w = w_ref[i][:oi, :ii]
        b = b_ref[i][:oi, :]
        h = jax.nn.relu(
            h
            + jnp.dot(w, h.astype(w.dtype), preferred_element_type=jnp.float32)
            + b
        )

    # Last layer: tanh(Wl @ h + bl) -> (n_plain, TM) lane-dense unmasked store.
    ol, il = dims[-1]
    wl = w_ref[num_layers - 1][:ol, :il]
    bl = b_ref[num_layers - 1][:ol, :]
    y = jnp.tanh(
        jnp.dot(wl, h.astype(wl.dtype), preferred_element_type=jnp.float32) + bl
    )
    out_ref[...] = y.astype(out_ref.dtype)


def pack_eve_params(params):
    """Consolidate per-layer (w:(out,in), b:(out,1)) into two zero-padded slabs."""
    dims = tuple((int(w.shape[0]), int(w.shape[1])) for w, _ in params)
    dmax = max(max(o, i) for o, i in dims)
    num_layers = len(params)
    w_slab = jnp.zeros((num_layers, dmax, dmax), jnp.bfloat16)
    b_slab = jnp.zeros((num_layers, dmax, 1), jnp.float32)
    for idx, (w, b) in enumerate(params):
        o, i = dims[idx]
        w_slab = w_slab.at[idx, :o, :i].set(w.astype(jnp.bfloat16))
        b_slab = b_slab.at[idx, :o, :].set(b.reshape(o, 1).astype(jnp.float32))
    return w_slab, b_slab, dims


def eve_forward(c, packed, *, tm=512):
    """c: (B, n_cipher) f32.  Returns lane-dense (n_plain, B) f32.

    tm should be a multiple of 128 (prefer 512/1024 so grid is 1-2 steps; keep
    grid=(2,) when targeting v7x so both TensorCores get a tile)."""
    w_slab, b_slab, dims = packed
    B, n_cipher = c.shape
    n_plain = dims[-1][0]
    num_layers, dmax, _ = w_slab.shape
    assert tm % 128 == 0, "tm must be a multiple of 128 (lane width)"

    n_tiles = pl.cdiv(B, tm)
    b_pad = n_tiles * tm

    x = c.astype(jnp.bfloat16)  # halve input DMA; kernel already uses bf16 MXU operands
    if b_pad != B:
        # Ragged tail: padded rows compute tanh(bias) and are sliced off below.
        x = jnp.pad(x, ((0, b_pad - B), (0, 0)))

    flops = sum(2 * b_pad * o * i for o, i in dims)
    bytes_accessed = (
        x.size * 2 + w_slab.size * 2 + b_slab.size * 4 + b_pad * n_plain * 4
    )

    kernel = functools.partial(eve_kernel, dims=dims)
    out_t = pl.pallas_call(
        kernel,
        out_shape=jax.ShapeDtypeStruct((n_plain, b_pad), jnp.float32),
        grid=(n_tiles,),
        in_specs=[
            # Input moves with the batch tile; natural layout, transpose fused into dot.
            pl.BlockSpec((tm, n_cipher), lambda i: (i, 0)),
            # Parameter slabs pinned at block (0,0,0): VMEM-resident, single-buffered.
            pl.BlockSpec((num_layers, dmax, dmax), lambda i: (0, 0, 0),
                         pipeline_mode=pl.Buffered(1)),
            pl.BlockSpec((num_layers, dmax, 1), lambda i: (0, 0, 0),
                         pipeline_mode=pl.Buffered(1)),
        ],
        out_specs=pl.BlockSpec((n_plain, tm), lambda i: (0, i)),
        compiler_params=pltpu.CompilerParams(
            dimension_semantics=("parallel",),  # v7x: shard batch tiles across both TCs
        ),
        cost_estimate=pl.CostEstimate(
            flops=flops,
            transcendentals=b_pad * n_plain,  # tanh on the output
            bytes_accessed=bytes_accessed,
        ),
    )(x, w_slab, b_slab)

    # Keep the lane-dense (n_plain, B) layout; transpose at the consumer if needed.
    return out_t[:, :B]


def init_eve_params(key, n_cipher, n_plain, hidden, depth):
    """Deterministic synthetic init. Returns list of (w:(out,in), b:(out,1)) like PyTorch."""
    dims_in = [n_cipher] + [hidden] * depth
    dims_out = [hidden] * depth + [n_plain]
    params = []
    for din, dout in zip(dims_in, dims_out):
        key, kw, kb = jax.random.split(key, 3)
        scale = 1.0 / jnp.sqrt(jnp.float32(din))
        w = jax.random.uniform(kw, (dout, din), jnp.float32, -scale, scale)
        b = jax.random.uniform(kb, (dout, 1), jnp.float32, -scale, scale)
        params.append((w, b))
    return params


def eve_reference(c, params, matmul_dtype=jnp.float32):
    """Pure-JAX reference matching the PyTorch forward (returns (B, n_plain)).

    With matmul_dtype=bf16 it mirrors the kernel's numerics (bf16 operands,
    f32 accumulation, f32 elementwise)."""
    def linear(x, w, b):
        y = jnp.dot(
            x.astype(matmul_dtype),
            w.astype(matmul_dtype).T,
            preferred_element_type=jnp.float32,
        )
        return y + b.reshape(1, -1)

    x = c
    depth = len(params) - 1
    for idx in range(depth):
        w, b = params[idx]
        y = linear(x, w, b)
        x = jax.nn.relu(y) if idx == 0 else jax.nn.relu(x + y)
    wl, bl = params[-1]
    return jnp.tanh(linear(x, wl, bl))


if __name__ == "__main__":
    # Hyperparameters implied by the module (hp.data.cipher/plain, hp.eve.hidden/depth).
    N_CIPHER, N_PLAIN = 16, 16
    HIDDEN, DEPTH = 32, 3
    BATCH, TM = 1024, 512  # grid=(2,): one step per TC on v7x, tiny overhead on v5e/v6e

    root = jax.random.PRNGKey(0)
    kc, kparams = jax.random.split(root, 2)
    c = jax.random.normal(kc, (BATCH, N_CIPHER), jnp.float32)
    params = init_eve_params(kparams, N_CIPHER, N_PLAIN, HIDDEN, DEPTH)
    packed = pack_eve_params(params)  # pack once, outside the per-call forward

    fwd = jax.jit(functools.partial(eve_forward, packed=packed, tm=TM))
    out_t = jax.block_until_ready(fwd(c))  # (n_plain, B) lane-dense

    assert out_t.shape == (N_PLAIN, BATCH)
    out = out_t.T  # (B, n_plain) only for the host-side correctness comparison

    # Kernel-numerics reference (bf16 MXU operands, f32 accumulation/elementwise).
    ref_bf16 = eve_reference(c, params, matmul_dtype=jnp.bfloat16)
    assert jnp.allclose(out, ref_bf16, atol=2e-3, rtol=2e-3), "mismatch vs bf16 reference"
    # Semantic sanity check against the full-f32 PyTorch-equivalent forward
    # (bf16 weights/operands are a deliberate precision trade; loose tolerance).
    ref_f32 = eve_reference(c, params, matmul_dtype=jnp.float32)
    assert jnp.allclose(out, ref_f32, atol=1e-1, rtol=1e-1), "mismatch vs f32 reference"
    print("KERNEL_OK")
</pallas_src>

<mosaic_0001>
module attributes {stable_mosaic.version = 11 : i64} {
  func.func @eve_kernel(%arg0: i32, %arg1: memref<512x16xbf16, #tpu.memory_space<vmem>>, %arg2: memref<4x32x32xbf16, #tpu.memory_space<vmem>>, %arg3: memref<4x32x1xf32, #tpu.memory_space<vmem>>, %arg4: memref<16x512xf32, #tpu.memory_space<vmem>>) attributes {dimension_semantics = [#tpu.dimension_semantics<parallel>], iteration_bounds = array<i64: 2>, scalar_prefetch = 0 : i64, scratch_operands = 0 : i64, tpu.core_type = #tpu.core_type<tc>, window_params = [{transform_indices = @transform_0, window_bounds = array<i64: 512, 16>}, {pipeline_mode = #tpu.pipeline_mode<synchronous>, transform_indices = @transform_1, window_bounds = array<i64: 4, 32, 32>}, {pipeline_mode = #tpu.pipeline_mode<synchronous>, transform_indices = @transform_2, window_bounds = array<i64: 4, 32, 1>}, {transform_indices = @transform_3, window_bounds = array<i64: 16, 512>}]} {
    %c0 = arith.constant 0 : index
    %c0_0 = arith.constant 0 : index
    %0 = vector.load %arg1[%c0, %c0_0] : memref<512x16xbf16, #tpu.memory_space<vmem>>, vector<512x16xbf16>
    %c0_1 = arith.constant 0 : index
    %c0_2 = arith.constant 0 : index
    %c0_3 = arith.constant 0 : index
    %1 = vector.load %arg2[%c0_1, %c0_2, %c0_3] : memref<4x32x32xbf16, #tpu.memory_space<vmem>>, vector<1x32x32xbf16>
    %2 = vector.shape_cast %1 : vector<1x32x32xbf16> to vector<32x32xbf16>
    %3 = vector.extract_strided_slice %2 {offsets = [0, 0], sizes = [32, 16], strides = [1, 1]} : vector<32x32xbf16> to vector<32x16xbf16>
    %c0_4 = arith.constant 0 : index
    %c0_5 = arith.constant 0 : index
    %c0_6 = arith.constant 0 : index
    %4 = vector.load %arg3[%c0_4, %c0_5, %c0_6] : memref<4x32x1xf32, #tpu.memory_space<vmem>>, vector<1x32x1xf32>
    %5 = vector.shape_cast %4 : vector<1x32x1xf32> to vector<32x1xf32>
    %cst = arith.constant dense<0.000000e+00> : vector<32x512xf32>
    %6 = tpu.matmul %3, %0, %cst {dimension_numbers = #tpu.dot_dimension_numbers<[1], [1], [0], [0], [0, 0, 1, 0], [], []>} : vector<32x16xbf16>, vector<512x16xbf16>, vector<32x512xf32> -> vector<32x512xf32>
    %7 = vector.broadcast %5 : vector<32x1xf32> to vector<32x512xf32>
    %8 = arith.addf %6, %7 : vector<32x512xf32>
    %cst_7 = arith.constant 0.000000e+00 : f32
    %9 = vector.broadcast %cst_7 : f32 to vector<32x512xf32>
    %10 = arith.maximumf %8, %9 : vector<32x512xf32>
    %c1 = arith.constant 1 : index
    %c0_8 = arith.constant 0 : index
    %c0_9 = arith.constant 0 : index
    %11 = vector.load %arg2[%c1, %c0_8, %c0_9] : memref<4x32x32xbf16, #tpu.memory_space<vmem>>, vector<1x32x32xbf16>
    %12 = vector.shape_cast %11 : vector<1x32x32xbf16> to vector<32x32xbf16>
    %c1_10 = arith.constant 1 : index
    %c0_11 = arith.constant 0 : index
    %c0_12 = arith.constant 0 : index
    %13 = vector.load %arg3[%c1_10, %c0_11, %c0_12] : memref<4x32x1xf32, #tpu.memory_space<vmem>>, vector<1x32x1xf32>
    %14 = vector.shape_cast %13 : vector<1x32x1xf32> to vector<32x1xf32>
    %15 = arith.truncf %10 : vector<32x512xf32> to vector<32x512xbf16>
    %cst_13 = arith.constant dense<0.000000e+00> : vector<32x512xf32>
    %16 = tpu.matmul %12, %15, %cst_13 {dimension_numbers = #tpu.dot_dimension_numbers<[1], [0], [0], [1], [0, 0, 1, 1], [], []>} : vector<32x32xbf16>, vector<32x512xbf16>, vector<32x512xf32> -> vector<32x512xf32>
    %17 = arith.addf %10, %16 : vector<32x512xf32>
    %18 = vector.broadcast %14 : vector<32x1xf32> to vector<32x512xf32>
    %19 = arith.addf %17, %18 : vector<32x512xf32>
    %cst_14 = arith.constant 0.000000e+00 : f32
    %20 = vector.broadcast %cst_14 : f32 to vector<32x512xf32>
    %21 = arith.maximumf %19, %20 : vector<32x512xf32>
    %c2 = arith.constant 2 : index
    %c0_15 = arith.constant 0 : index
    %c0_16 = arith.constant 0 : index
    %22 = vector.load %arg2[%c2, %c0_15, %c0_16] : memref<4x32x32xbf16, #tpu.memory_space<vmem>>, vector<1x32x32xbf16>
    %23 = vector.shape_cast %22 : vector<1x32x32xbf16> to vector<32x32xbf16>
    %c2_17 = arith.constant 2 : index
    %c0_18 = arith.constant 0 : index
    %c0_19 = arith.constant 0 : index
    %24 = vector.load %arg3[%c2_17, %c0_18, %c0_19] : memref<4x32x1xf32, #tpu.memory_space<vmem>>, vector<1x32x1xf32>
    %25 = vector.shape_cast %24 : vector<1x32x1xf32> to vector<32x1xf32>
    %26 = arith.truncf %21 : vector<32x512xf32> to vector<32x512xbf16>
    %cst_20 = arith.constant dense<0.000000e+00> : vector<32x512xf32>
    %27 = tpu.matmul %23, %26, %cst_20 {dimension_numbers = #tpu.dot_dimension_numbers<[1], [0], [0], [1], [0, 0, 1, 1], [], []>} : vector<32x32xbf16>, vector<32x512xbf16>, vector<32x512xf32> -> vector<32x512xf32>
    %28 = arith.addf %21, %27 : vector<32x512xf32>
    %29 = vector.broadcast %25 : vector<32x1xf32> to vector<32x512xf32>
    %30 = arith.addf %28, %29 : vector<32x512xf32>
    %cst_21 = arith.constant 0.000000e+00 : f32
    %31 = vector.broadcast %cst_21 : f32 to vector<32x512xf32>
    %32 = arith.maximumf %30, %31 : vector<32x512xf32>
    %c3 = arith.constant 3 : index
    %c0_22 = arith.constant 0 : index
    %c0_23 = arith.constant 0 : index
    %33 = vector.load %arg2[%c3, %c0_22, %c0_23] : memref<4x32x32xbf16, #tpu.memory_space<vmem>>, vector<1x32x32xbf16>
    %34 = vector.shape_cast %33 : vector<1x32x32xbf16> to vector<32x32xbf16>
    %35 = vector.extract_strided_slice %34 {offsets = [0, 0], sizes = [16, 32], strides = [1, 1]} : vector<32x32xbf16> to vector<16x32xbf16>
    %c3_24 = arith.constant 3 : index
    %c0_25 = arith.constant 0 : index
    %c0_26 = arith.constant 0 : index
    %36 = vector.load %arg3[%c3_24, %c0_25, %c0_26] : memref<4x32x1xf32, #tpu.memory_space<vmem>>, vector<1x32x1xf32>
    %37 = vector.shape_cast %36 : vector<1x32x1xf32> to vector<32x1xf32>
    %38 = vector.extract_strided_slice %37 {offsets = [0, 0], sizes = [16, 1], strides = [1, 1]} : vector<32x1xf32> to vector<16x1xf32>
    %39 = arith.truncf %32 : vector<32x512xf32> to vector<32x512xbf16>
    %cst_27 = arith.constant dense<0.000000e+00> : vector<16x512xf32>
    %40 = tpu.matmul %35, %39, %cst_27 {dimension_numbers = #tpu.dot_dimension_numbers<[1], [0], [0], [1], [0, 0, 1, 1], [], []>} : vector<16x32xbf16>, vector<32x512xbf16>, vector<16x512xf32> -> vector<16x512xf32>
    %41 = vector.broadcast %38 : vector<16x1xf32> to vector<16x512xf32>
    %42 = arith.addf %40, %41 : vector<16x512xf32>
    %43 = math.tanh %42 : vector<16x512xf32>
    %c0_28 = arith.constant 0 : index
    %c0_29 = arith.constant 0 : index
    %44 = vector.load %arg4[%c0_28, %c0_29] : memref<16x512xf32, #tpu.memory_space<vmem>>, vector<16x512xf32>
    tpu.vector_store %arg4[%c0_28, %c0_29], %43 {strides = array<i32>} : memref<16x512xf32, #tpu.memory_space<vmem>>, vector<16x512xf32>,
    return
  }
  func.func @transform_0(%arg0: i32) -> (i32, i32) {
    %c0_i32 = arith.constant 0 : i32
    %c0_i32_0 = arith.constant 0 : i32
    return %arg0, %c0_i32 : i32, i32
  }
  func.func @transform_1(%arg0: i32) -> (i32, i32, i32) {
    %c0_i32 = arith.constant 0 : i32
    %c0_i32_0 = arith.constant 0 : i32
    %c0_i32_1 = arith.constant 0 : i32
    %c0_i32_2 = arith.constant 0 : i32
    return %c0_i32, %c0_i32_0, %c0_i32_1 : i32, i32, i32
  }
  func.func @transform_2(%arg0: i32) -> (i32, i32, i32) {
    %c0_i32 = arith.constant 0 : i32
    %c0_i32_0 = arith.constant 0 : i32
    %c0_i32_1 = arith.constant 0 : i32
    %c0_i32_2 = arith.constant 0 : i32
    return %c0_i32, %c0_i32_0, %c0_i32_1 : i32, i32, i32
  }
  func.func @transform_3(%arg0: i32) -> (i32, i32) {
    %c0_i32 = arith.constant 0 : i32
    %c0_i32_0 = arith.constant 0 : i32
    return %c0_i32, %arg0 : i32, i32
  }
}

</mosaic_0001>

<bundles_post_ra>
// kernel: eve_forward.1
= control target key start
LH: loop header
LB: loop body
LE: loop exit
PB: predicated region body
PF: predicated region fallthrough
CT: control target
= control target key end

     0   :  { %8 = vsyncpa [#allocation3], 0  ;;  %s2055_s0 = inlined_call_operand.vmem [shape: bf16[1024,16], index: 0, kind: input, shape index: {}]   ;;  %s2056_s1 = inlined_call_operand.vmem [shape: bf16[4,32,32], index: 1, kind: input, shape index: {}]   ;;  %s2057_s2 = inlined_call_operand.vmem [shape: f32[4,32,1], index: 2, kind: input, shape index: {}]   ;;  %s2058_s3 = inlined_call_operand.hbm [shape: f32[16,1024], index: 3, kind: output, shape index: {}]  }
   0x1   :  { %10 = vsyncpa [#allocation3 + $0x1], 0  ;;  %s1575_s12 = smov 0   ;;  %s1577_s13 = smov 0  }
   0x2   :  { %s1579_s14 = smov 0   ;;  %s1581_s15 = smov 0  }
   0x3 LB: > { %s1596_s16 = sadd.s32 4294967295, %s1549_s15   ;;  %s1169_s17 = sadd.s32 4294967294, %s1549_s15   ;;  %s1549_s15 = sphi %s1581_s15, %s2064_s15   ;;  %s1545_s14 = sphi %s1579_s14, %s2063_s14   ;;  %s1541_s13 = sphi %s1577_s13, %s2062_s13   ;;  %s1537_s12 = sphi %s1575_s12, %s2061_s12  }
   0x4   : > { %s1600_s18 = sadd.s32 1, %s1549_s15   ;;  %s91_s19 = sadd.s32 1, %s1545_s14 }
   0x5   : > { %s88_s20 = ssub.s32 %s1549_s15, %s1600_s18  ;;  %p101_p0 = scmp.ne.s32.totalorder %s1545_s14, %s1541_s13 }
   0x6   : > { %p89_p1 = scmp.eq.s32.totalorder %s88_s20, 0  ;;  %p102_p2 = scmp.eq.s32.totalorder %s1596_s16, 1 }
   0x7   : > { %p107_p3 = scmp.ne.s32.totalorder %s1541_s13, %s1537_s12  ;;  %p108_p4 = scmp.eq.s32.totalorder %s1169_s17, 1 }
   0x8   : > { %s1611_s21 = scalar_select %p89_p1, %s1545_s14, %s91_s19  }
   0x9   : > { %p1613_p5 = por %p102_p2, %p101_p0  ;;  %p1617_p6 = por %p108_p4, %p107_p3 }
   0xa   : > { %p1172_p7 = scmp.ge.s32.totalorder %s1549_s15, 1  ;;  %p141_p8 = scmp.lt.s32.totalorder %s1549_s15, 3 }
   0xc   : > { %p142_p9 = pnand %p1172_p7, %p141_p8 }
   0xd   : > { %s1174_s24 = sshll.u32 (!%p142_p9), %s1596_s16, 6  ;;  %s162_s8 = sand.u32 (!%p142_p9), 1, %s1541_s13  }
   0xe   : > { %145 = sbr.rel (%p142_p9) target bundleno = 755 (0x2f3), region = 32  ;;  %p166_p10 = scmp.lt.s32.totalorder (!%p142_p9), %s1174_s24, 127 }
   0xf   : > { %s1173_s9 = sshll.u32 (!%p142_p9), %s162_s8, 6  ;;  %s1424_s11 = sshll.u32 (!%p142_p9), %s1596_s16, 5 }
  0x10   : > { %s2011_s10 = scalar_lea.vmem (!%p142_p9), [#allocation2], %s1173_s9  ;;  %s1103_s20 = scalar_lea.hbm (!%p142_p9), %s2058_s3, %s1424_s11 }
  0x11   : > { %s1106_s16 = sshll.u32 (!%p142_p9), %s1103_s20, 4  ;;  %s1507_s30 = scalar_lea.hbm (!%p142_p9), %s2058_s3, 128  ;;  %s1107_s16 = int_to_ptr.hbm [resolvable:$true] %s1106_s16 }
  0x12   : > { %s1501_s26 = sshra.s32 (!%p142_p9), %s1107_s16, 4  ;;  %s1502_s26 = int_to_ptr.hbm [resolvable:$true] %s1501_s26 }
  0x13   : > { %s2066_s24 = smov (!%p166_p10, %s1174_s24), 127  ;;  %vm435_vm0 = vcmask 130048   ;;  %v1551_v36 = vmov 0   ;;  %v243_v41 = vld [vmem:[%s2057_s2 + $0x10] sm:$0xff]  ;;  %v241_v42 = vld [vmem:[%s2057_s2] sm:$0xff]  ;;  %v244_v51 = vld [vmem:[%s2057_s2 + $0x18] sm:$0xff]  ;;  %p1508_p0 = scmp.lt.s32.totalorder %s1502_s26, %s2058_s3 }
  0x14   : > { %s1175_s25 = sshll.u32 %s2066_s24, 2  ;;  %1468 = vset.pattern.permute.xlu0 %v1551_v36  ;;  %1469 = vset.pattern.permute.xlu1 %v1551_v36  ;;  %v242_v52 = vld [vmem:[%s2057_s2 + $0x8] sm:$0xff]  ;;  %v1324_v61 = vld [vmem:[%s2057_s2 + $0x20] sm:$0xff]  ;;  %vm658_vm1 = vcmask 261120   ;;  %s1104_s24 = sshll.u32 %s2011_s10, 4  ;;  %s1105_s24 = int_to_ptr.vmem [resolvable:$true] %s1104_s24 }
  0x15   : > { %s1627_s28 = scalar_lea.vmem %s2055_s0, %s1175_s25  ;;  %1470 = vset.pattern.permute.xlu2 %v1551_v36  ;;  %257 = vperm.xlu0 %1468, %v243_v41   ;;  %v1325_v62 = vld [vmem:[%s2057_s2 + $0x28] sm:$0xff]  ;;  %s1092_s25 = scalar_lea.sflag [#allocation3], %s162_s8 }
  0x16   : > { %v1392_v0 = vld [vmem:[%s1627_s28 + $0x38] sm:$0xff]  ;;  %v1391_v8 = vld [vmem:[%s1627_s28 + $0x30] sm:$0xff]  ;;  %v1390_v16 = vld [vmem:[%s1627_s28 + $0x28] sm:$0xff]  ;;  %247 = vperm.xlu1 %1469, %v241_v42   ;;  %s1503_s27 = scalar_lea.hbm %s1502_s26, 64 }
  0x17   : > { %v1400_v1 = vld [vmem:[%s1627_s28 + $0x78] sm:$0xff]  ;;  %v464_v4 = vsel %vm435_vm0, %v1392_v0, 0  ;;  %v1399_v9 = vld [vmem:[%s1627_s28 + $0x70] sm:$0xff]  ;;  %v461_v12 = vsel %vm435_vm0, %v1391_v8, 0  ;;  %v1398_v17 = vld [vmem:[%s1627_s28 + $0x68] sm:$0xff]  ;;  %v458_v20 = vsel %vm435_vm0, %v1390_v16, 0  ;;  %p1504_p11 = scmp.ne.s32.totalorder %s1502_s26, %s1503_s27  ;;  %p1509_p1 = scmp.lt.s32.totalorder %s1507_s30, %s1503_s27 }
  0x18   : > { %v1408_v2 = vld [vmem:[%s1627_s28 + $0xb8] sm:$0xff]  ;;  %v488_v5 = vsel %vm435_vm0, %v1400_v1, 0  ;;  %538 = vmatpush.bf16.xpose.msra.mxu0 %v464_v4  ;;  %v1407_v10 = vld [vmem:[%s1627_s28 + $0xb0] sm:$0xff]  ;;  %v485_v13 = vsel %vm435_vm0, %v1399_v9, 0  ;;  %v1406_v18 = vld [vmem:[%s1627_s28 + $0xa8] sm:$0xff]  ;;  %v482_v21 = vsel %vm435_vm0, %v1398_v17, 0 }
  0x19   : > { %v1416_v3 = vld [vmem:[%s1627_s28 + $0xf8] sm:$0xff]  ;;  %v512_v6 = vsel %vm435_vm0, %v1408_v2, 0  ;;  %557 = vmatpush.bf16.xpose.msra.mxu1 %v488_v5  ;;  %v1415_v11 = vld [vmem:[%s1627_s28 + $0xf0] sm:$0xff]  ;;  %v509_v14 = vsel %vm435_vm0, %v1407_v10, 0  ;;  %v1414_v19 = vld [vmem:[%s1627_s28 + $0xe8] sm:$0xff]  ;;  %v506_v22 = vsel %vm435_vm0, %v1406_v18, 0  ;;  %p1505_p12 = pnand %p1504_p11, %p1613_p5  ;;  %p1510_p2 = por %p1509_p1, %p1508_p0 }
  0x1a   : > { %v536_v7 = vsel %vm435_vm0, %v1416_v3, 0  ;;  %576 = vmatpush.bf16.xpose.msra.mxu2 %v512_v6  ;;  %v533_v15 = vsel %vm435_vm0, %v1415_v11, 0  ;;  %v530_v23 = vsel %vm435_vm0, %v1414_v19, 0  ;;  %v1389_v24 = vld [vmem:[%s1627_s28 + $0x20] sm:$0xff]  ;;  %v1388_v32 = vld [vmem:[%s1627_s28 + $0x18] sm:$0xff]  ;;  %v1387_v43 = vld [vmem:[%s1627_s28 + $0x10] sm:$0xff] }
  0x1b   : > { %595 = vmatpush.bf16.xpose.msra.mxu3 %v536_v7  ;;  %v1397_v25 = vld [vmem:[%s1627_s28 + $0x60] sm:$0xff]  ;;  %v455_v28 = vsel %vm435_vm0, %v1389_v24, 0  ;;  %v1396_v33 = vld [vmem:[%s1627_s28 + $0x58] sm:$0xff]  ;;  %v452_v37 = vsel %vm435_vm0, %v1388_v32, 0  ;;  %v1395_v44 = vld [vmem:[%s1627_s28 + $0x50] sm:$0xff]  ;;  %v449_v47 = vsel %vm435_vm0, %v1387_v43, 0  ;;  %p1506_p13 = pneg %p1505_p12 }
  0x1c   : > { %v1405_v26 = vld [vmem:[%s1627_s28 + $0xa0] sm:$0xff]  ;;  %v479_v29 = vsel %vm435_vm0, %v1397_v25, 0  ;;  %v1404_v34 = vld [vmem:[%s1627_s28 + $0x98] sm:$0xff]  ;;  %v476_v38 = vsel %vm435_vm0, %v1396_v33, 0  ;;  %v1403_v45 = vld [vmem:[%s1627_s28 + $0x90] sm:$0xff]  ;;  %v473_v48 = vsel %vm435_vm0, %v1395_v44, 0 }
  0x1d   : > { %v1413_v27 = vld [vmem:[%s1627_s28 + $0xe0] sm:$0xff]  ;;  %v503_v30 = vsel %vm435_vm0, %v1405_v26, 0  ;;  %v1412_v35 = vld [vmem:[%s1627_s28 + $0xd8] sm:$0xff]  ;;  %v500_v39 = vsel %vm435_vm0, %v1404_v34, 0  ;;  %v1411_v46 = vld [vmem:[%s1627_s28 + $0xd0] sm:$0xff]  ;;  %v497_v49 = vsel %vm435_vm0, %v1403_v45, 0  ;;  %262 = vperm.xlu0 %1468, %v244_v51   ;;  %p1511_p3 = pnand %p1510_p2, %p1506_p13 }
  0x1e   : > { %v527_v31 = vsel %vm435_vm0, %v1413_v27, 0  ;;  %v524_v40 = vsel %vm435_vm0, %v1412_v35, 0  ;;  %v521_v50 = vsel %vm435_vm0, %v1411_v46, 0  ;;  %v1386_v53 = vld [vmem:[%s1627_s28 + $0x8] sm:$0xff]  ;;  %252 = vperm.xlu1 %1469, %v242_v52   ;;  %v1385_v63 = vld [vmem:[%s1627_s28] sm:$0xff]  ;;  %v1351_v7 = vld [vmem:[%s2057_s2 + $0x58] sm:$0xff] }
  0x1f   : > { %v1394_v54 = vld [vmem:[%s1627_s28 + $0x48] sm:$0xff]  ;;  %v446_v57 = vsel %vm435_vm0, %v1386_v53, 0  ;;  %v1393_v0 = vld [vmem:[%s1627_s28 + $0x40] sm:$0xff]  ;;  %v443_v3 = vsel %vm435_vm0, %v1385_v63, 0 }
  0x20   : > { %539 = vmatpush.bf16.xpose.msra.mxu0 %v461_v12  ;;  %v1402_v55 = vld [vmem:[%s1627_s28 + $0x88] sm:$0xff]  ;;  %v470_v58 = vsel %vm435_vm0, %v1394_v54, 0  ;;  %v1401_v1 = vld [vmem:[%s1627_s28 + $0x80] sm:$0xff]  ;;  %v467_v4 = vsel %vm435_vm0, %v1393_v0, 0 }
  0x21   : > { %558 = vmatpush.bf16.xpose.msra.mxu1 %v485_v13  ;;  %v1410_v56 = vld [vmem:[%s1627_s28 + $0xc8] sm:$0xff]  ;;  %v494_v59 = vsel %vm435_vm0, %v1402_v55, 0  ;;  %v1409_v2 = vld [vmem:[%s1627_s28 + $0xc0] sm:$0xff]  ;;  %v491_v5 = vsel %vm435_vm0, %v1401_v1, 0 }
  0x22   : > { %577 = vmatpush.bf16.xpose.msra.mxu2 %v509_v14  ;;  %v518_v60 = vsel %vm435_vm0, %v1410_v56, 0  ;;  %v515_v6 = vsel %vm435_vm0, %v1409_v2, 0  ;;  %v1348_v8 = vld [vmem:[%s2057_s2 + $0x40] sm:$0xff]  ;;  %v1371_v11 = vld [vmem:[%s2057_s2 + $0x68] sm:$0xff]  ;;  %v1419_v2 = vld [vmem:[%s2056_s1 + $0x10] sm:$0xff] }
  0x23   : > { %596 = vmatpush.bf16.xpose.msra.mxu3 %v533_v15  ;;  %v1417_v9 = vld [vmem:[%s2056_s1] sm:$0xff]  ;;  %v1418_v12 = vld [vmem:[%s2056_s1 + $0x8] sm:$0xff] }
  0x24   : > { %v1370_v10 = vld [vmem:[%s2057_s2 + $0x60] sm:$0xff] }
  0x25   : > { %759 = vperm.xlu0 %1468, %v1324_v61  }
  0x26   : > { %764 = vperm.xlu1 %1469, %v1325_v62  }
  0x28   : > { %540 = vmatpush.bf16.xpose.msra.mxu0 %v458_v20 }
  0x29   : > { %559 = vmatpush.bf16.xpose.msra.mxu1 %v482_v21 }
  0x2a   : > { %578 = vmatpush.bf16.xpose.msra.mxu2 %v506_v22 }
  0x2b   : > { %597 = vmatpush.bf16.xpose.msra.mxu3 %v530_v23 }
  0x2d   : > { %952 = vperm.xlu0 %1468, %v1351_v7   ;;  %v1327_v7 = vld [vmem:[%s2057_s2 + $0x38] sm:$0xff] }
  0x2e   : > { %937 = vperm.xlu1 %1469, %v1348_v8  }
  0x30   : > { %541 = vmatpush.bf16.xpose.msra.mxu0 %v455_v28 }
  0x31   : > { %560 = vmatpush.bf16.xpose.msra.mxu1 %v479_v29 }
  0x32   : > { %579 = vmatpush.bf16.xpose.msra.mxu2 %v503_v30 }
  0x33   : > { %598 = vmatpush.bf16.xpose.msra.mxu3 %v527_v31 }
  0x35   : > { %1003 = vperm.xlu0 %1468, %v1370_v10  }
  0x36   : > { %1008 = vperm.xlu1 %1469, %v1371_v11  }
  0x38   : > { %542 = vmatpush.bf16.xpose.msra.mxu0 %v452_v37 }
  0x39   : > { %561 = vmatpush.bf16.xpose.msra.mxu1 %v476_v38 }
  0x3a   : > { %580 = vmatpush.bf16.xpose.msra.mxu2 %v500_v39 }
  0x3b   : > { %599 = vmatpush.bf16.xpose.msra.mxu3 %v524_v40 }
  0x40   : > { %543 = vmatpush.bf16.xpose.msra.mxu0 %v449_v47 }
  0x41   : > { %562 = vmatpush.bf16.xpose.msra.mxu1 %v473_v48 }
  0x42   : > { %581 = vmatpush.bf16.xpose.msra.mxu2 %v497_v49  ;;  %v1326_v49 = vld [vmem:[%s2057_s2 + $0x30] sm:$0xff] }
  0x43   : > { %600 = vmatpush.bf16.xpose.msra.mxu3 %v521_v50  ;;  %769 = vperm.xlu2 %1470, %v1326_v49  }
  0x48   : > { %544 = vmatpush.bf16.xpose.msra.mxu0 %v446_v57 }
  0x49   : > { %563 = vmatpush.bf16.xpose.msra.mxu1 %v470_v58 }
  0x4a   : > { %582 = vmatpush.bf16.xpose.msra.mxu2 %v494_v59 }
  0x4b   : > { %601 = vmatpush.bf16.xpose.msra.mxu3 %v518_v60  ;;  %774 = vperm.xlu2 %1470, %v1327_v7  }
  0x50   : > { %545 = vmatpush.bf16.xpose.msra.mxu0 %v443_v3 }
  0x51   : > { %564 = vmatpush.bf16.xpose.msra.mxu1 %v467_v4 }
  0x52   : > { %583 = vmatpush.bf16.xpose.msra.mxu2 %v491_v5 }
  0x53   : > { %602 = vmatpush.bf16.xpose.msra.mxu3 %v515_v6 }
  0x57   : > { %1312 = vmatmul.msk.bf16.vlgmr.msra.gmra.mxu0 %vm435_vm0, %v1417_v9 }
  0x58   : > { %1314 = vmatmul.msk.bf16.vlgmr.msra.gmra.mxu1 %vm435_vm0, %v1417_v9 }
  0x59   : > { %1316 = vmatmul.msk.bf16.vlgmr.msra.gmra.mxu2 %vm435_vm0, %v1417_v9 }
  0x5a   : > { %1318 = vmatmul.msk.bf16.vlgmr.msra.gmra.mxu3 %vm435_vm0, %v1417_v9 }
  0x67   : > { %1313 = vmatmul.msk.bf16.gmra.mxu0 %vm435_vm0, %v1418_v12 }
  0x68   : > { %1315 = vmatmul.msk.bf16.gmra.mxu1 %vm435_vm0, %v1418_v12 }
  0x69   : > { %1317 = vmatmul.msk.bf16.gmra.mxu2 %vm435_vm0, %v1418_v12 }
  0x6a   : > { %1319 = vmatmul.msk.bf16.gmra.mxu3 %vm435_vm0, %v1418_v12  ;;  %v1350_v12 = vld [vmem:[%s2057_s2 + $0x50] sm:$0xff] }
  0x6b   : > { %947 = vperm.xlu2 %1470, %v1350_v12  }
  0x87   : > { %v258_v19 = vpop.permute.xlu0 %257 }
  0x88   : > { %v248_v20 = vpop.permute.xlu1 %247 }
  0x8f   : > { %v263_v25 = vpop.permute.xlu0 %262 }
  0x90   : > { %v253_v26 = vpop.permute.xlu1 %252 }
  0xd4   : > { %v547_v13 = vpop.f32.mrf.mxu0 }
  0xd5   : > { %v566_v14 = vpop.f32.mrf.mxu1  ;;  %v1741_v31 = vadd.f32 %v547_v13, %v248_v20  ;;  %v1420_v13 = vld [vmem:[%s2056_s1 + $0x18] sm:$0xff] }
  0xd6   : > { %v1743_v32 = vadd.f32 %v566_v14, %v248_v20  ;;  %v1349_v14 = vld [vmem:[%s2057_s2 + $0x48] sm:$0xff] }
  0xd7   : > { %v614_v43 = vmax.f32 %v1741_v31, 0.0  ;;  %942 = vperm.xlu2 %1470, %v1349_v14  }
  0xd8   : > { %v615_v44 = vmax.f32 %v1743_v32, 0.0 }
  0xdc   : > { %v585_v15 = vpop.f32.mrf.mxu2  ;;  %v549_v17 = vpop.f32.mrf.mxu0 }
  0xdd   : > { %v604_v16 = vpop.f32.mrf.mxu3  ;;  %v568_v18 = vpop.f32.mrf.mxu1  ;;  %v1745_v35 = vadd.f32 %v549_v17, %v253_v26  ;;  %v1784_v58 = vadd.f32 %v585_v15, %v248_v20 }
  0xde   : > { %v1747_v36 = vadd.f32 %v568_v18, %v253_v26  ;;  %v1786_v59 = vadd.f32 %v604_v16, %v248_v20 }
  0xdf   : > { %v618_v45 = vmax.f32 %v1745_v35, 0.0  ;;  %v616_v8 = vmax.f32 %v1784_v58, 0.0 }
  0xe0   : > { %v619_v46 = vmax.f32 %v1747_v36, 0.0  ;;  %v617_v9 = vmax.f32 %v1786_v59, 0.0  ;;  %v765_v36 = vpop.permute.xlu1 %764 }
  0xe1   : > { %v640_v60 = vpack.c.bf16 %v618_v45, %v614_v43 }
  0xe2   : > { %v641_v61 = vpack.c.bf16 %v619_v46, %v615_v44 }
  0xe4   : > { %v587_v21 = vpop.f32.mrf.mxu2  ;;  %v552_v23 = vpop.f32.mrf.mxu0 }
  0xe5   : > { %v606_v22 = vpop.f32.mrf.mxu3  ;;  %v571_v24 = vpop.f32.mrf.mxu1  ;;  %v1737_v27 = vadd.f32 %v552_v23, %v258_v19  ;;  %v1776_v54 = vadd.f32 %v587_v21, %v253_v26 }
  0xe6   : > { %v1739_v28 = vadd.f32 %v571_v24, %v258_v19  ;;  %v1778_v55 = vadd.f32 %v606_v22, %v253_v26  ;;  %v770_v21 = vpop.permute.xlu2 %769 }
  0xe7   : > { %v622_v39 = vmax.f32 %v1737_v27, 0.0  ;;  %v620_v3 = vmax.f32 %v1776_v54, 0.0 }
  0xe8   : > { %v623_v40 = vmax.f32 %v1739_v28, 0.0  ;;  %v621_v4 = vmax.f32 %v1778_v55, 0.0 }
  0xe9   : > { %v642_v10 = vpack.c.bf16 %v620_v3, %v616_v8 }
  0xea   : > { %v643_v11 = vpack.c.bf16 %v621_v4, %v617_v9 }
  0xec   : > { %v590_v29 = vpop.f32.mrf.mxu2  ;;  %v554_v33 = vpop.f32.mrf.mxu0 }
  0xed   : > { %v609_v30 = vpop.f32.mrf.mxu3  ;;  %v573_v34 = vpop.f32.mrf.mxu1  ;;  %v1749_v37 = vadd.f32 %v554_v33, %v263_v25  ;;  %v1772_v50 = vadd.f32 %v590_v29, %v258_v19 }
  0xee   : > { %v1751_v38 = vadd.f32 %v573_v34, %v263_v25  ;;  %v1774_v51 = vadd.f32 %v609_v30, %v258_v19 }
  0xef   : > { %v626_v41 = vmax.f32 %v1749_v37, 0.0  ;;  %v624_v62 = vmax.f32 %v1772_v50, 0.0 }
  0xf0   : > { %v627_v42 = vmax.f32 %v1751_v38, 0.0  ;;  %v625_v63 = vmax.f32 %v1774_v51, 0.0 }
  0xf1   : > { %v644_v47 = vpack.c.bf16 %v626_v41, %v622_v39 }
  0xf2   : > { %v645_v48 = vpack.c.bf16 %v627_v42, %v623_v40 }
  0xf3   : > { %671 = vmatpush.bf16.msrb.mxu0 %v644_v47 }
  0xf4   : > { %v592_v52 = vpop.f32.mrf.mxu2  ;;  %690 = vmatpush.bf16.msrb.mxu1 %v645_v48 }
  0xf5   : > { %v611_v53 = vpop.f32.mrf.mxu3  ;;  %v1780_v56 = vadd.f32 %v592_v52, %v263_v25 }
  0xf6   : > { %v1782_v57 = vadd.f32 %v611_v53, %v263_v25 }
  0xf7   : > { %v628_v0 = vmax.f32 %v1780_v56, 0.0  ;;  %672 = vmatpush.bf16.msrb.mxu0 %v640_v60 }
  0xf8   : > { %v629_v1 = vmax.f32 %v1782_v57, 0.0  ;;  %691 = vmatpush.bf16.msrb.mxu1 %v641_v61 }
  0xf9   : > { %v646_v5 = vpack.c.bf16 %v628_v0, %v624_v62 }
  0xfa   : > { %v647_v6 = vpack.c.bf16 %v629_v1, %v625_v63  ;;  %1336 = vmatmul.msk.bf16.vlgmr.msrb.gmra.mxu0 %vm658_vm1, %v1419_v2 }
  0xfb   : > { %709 = vmatpush.bf16.msrb.mxu2 %v646_v5  ;;  %1338 = vmatmul.msk.bf16.vlgmr.msrb.gmra.mxu1 %vm658_vm1, %v1419_v2 }
  0xfc   : > { %728 = vmatpush.bf16.msrb.mxu3 %v647_v6 }
  0xff   : > { %710 = vmatpush.bf16.msrb.mxu2 %v642_v10 }
 0x100   : > { %729 = vmatpush.bf16.msrb.mxu3 %v643_v11 }
 0x102   : > { %1340 = vmatmul.msk.bf16.vlgmr.msrb.gmra.mxu2 %vm658_vm1, %v1419_v2 }
 0x103   : > { %1342 = vmatmul.msk.bf16.vlgmr.msrb.gmra.mxu3 %vm658_vm1, %v1419_v2 }
 0x10a   : > { %1337 = vmatmul.msk.bf16.gmra.mxu0 %vm658_vm1, %v1420_v13 }
 0x10b   : > { %1339 = vmatmul.msk.bf16.gmra.mxu1 %vm658_vm1, %v1420_v13 }
 0x112   : > { %1341 = vmatmul.msk.bf16.gmra.mxu2 %vm658_vm1, %v1420_v13 }
 0x113   : > { %1343 = vmatmul.msk.bf16.gmra.mxu3 %vm658_vm1, %v1420_v13 }
 0x177   : > { %v674_v15 = vpop.f32.mrf.mxu0 }
 0x178   : > { %v693_v16 = vpop.f32.mrf.mxu1  ;;  %v741_v34 = vadd.f32 %v674_v15, %v614_v43 }
 0x179   : > { %v742_v47 = vadd.f32 %v693_v16, %v615_v44 }
 0x17f   : > { %v676_v17 = vpop.f32.mrf.mxu0 }
 0x180   : > { %v695_v18 = vpop.f32.mrf.mxu1  ;;  %v745_v30 = vadd.f32 %v676_v17, %v618_v45 }
 0x181   : > { %v746_v33 = vadd.f32 %v695_v18, %v619_v46 }
 0x182   : > { %v1863_v31 = vadd.f32 %v765_v36, %v745_v30  ;;  %v1422_v30 = vld [vmem:[%s2056_s1 + $0x28] sm:$0xff] }
 0x183   : > { %v1865_v43 = vadd.f32 %v765_v36, %v746_v33 }
 0x184   : > { %v797_v61 = vmax.f32 %v1863_v31, 0.0 }
 0x185   : > { %v712_v19 = vpop.f32.mrf.mxu2  ;;  %v798_v2 = vmax.f32 %v1865_v43, 0.0 }
 0x186   : > { %v731_v20 = vpop.f32.mrf.mxu3  ;;  %v743_v51 = vadd.f32 %v712_v19, %v616_v8 }
 0x187   : > { %v679_v22 = vpop.f32.mrf.mxu0  ;;  %v744_v54 = vadd.f32 %v731_v20, %v617_v9 }
 0x188   : > { %v698_v23 = vpop.f32.mrf.mxu1  ;;  %v749_v26 = vadd.f32 %v679_v22, %v622_v39  ;;  %v775_v39 = vpop.permute.xlu2 %774 }
 0x189   : > { %v750_v29 = vadd.f32 %v698_v23, %v623_v40  ;;  %v760_v40 = vpop.permute.xlu0 %759 }
 0x18a   : > { %v1855_v52 = vadd.f32 %v770_v21, %v749_v26  ;;  %v1871_v45 = vadd.f32 %v760_v40, %v741_v34  ;;  %v1873_v46 = vadd.f32 %v760_v40, %v742_v47  ;;  %v1930_v18 = vadd.f32 %v760_v40, %v743_v51 }
 0x18b   : > { %v1857_v27 = vadd.f32 %v770_v21, %v750_v29  ;;  %v1932_v19 = vadd.f32 %v760_v40, %v744_v54 }
 0x18c   : > { %v801_v38 = vmax.f32 %v1855_v52, 0.0  ;;  %v793_v10 = vmax.f32 %v1871_v45, 0.0  ;;  %v794_v11 = vmax.f32 %v1873_v46, 0.0 }
 0x18d   : > { %v714_v24 = vpop.f32.mrf.mxu2 }
 0x18e   : > { %v733_v25 = vpop.f32.mrf.mxu3  ;;  %v747_v13 = vadd.f32 %v714_v24, %v620_v3  ;;  %v819_v50 = vpack.c.bf16 %v797_v61, %v793_v10  ;;  %v795_v24 = vmax.f32 %v1930_v18, 0.0 }
 0x18f   : > { %v681_v48 = vpop.f32.mrf.mxu0  ;;  %v748_v14 = vadd.f32 %v733_v25, %v621_v4  ;;  %v1421_v4 = vld [vmem:[%s2056_s1 + $0x20] sm:$0xff]  ;;  %v796_v25 = vmax.f32 %v1932_v19, 0.0 }
 0x190   : > { %v700_v49 = vpop.f32.mrf.mxu1  ;;  %v753_v28 = vadd.f32 %v681_v48, %v626_v41  ;;  %v1922_v59 = vadd.f32 %v765_v36, %v747_v13 }
 0x191   : > { %v754_v35 = vadd.f32 %v700_v49, %v627_v42  ;;  %v802_v42 = vmax.f32 %v1857_v27, 0.0  ;;  %v1924_v8 = vadd.f32 %v765_v36, %v748_v14  ;;  %v948_v49 = vpop.permute.xlu2 %947  ;;  %v953_v14 = vpop.permute.xlu0 %952 }
 0x192   : > { %v1867_v32 = vadd.f32 %v775_v39, %v753_v28  ;;  %v799_v20 = vmax.f32 %v1922_v59, 0.0 }
 0x193   : > { %v1869_v44 = vadd.f32 %v775_v39, %v754_v35 }
 0x194   : > { %v805_v53 = vmax.f32 %v1867_v32, 0.0  ;;  %v821_v26 = vpack.c.bf16 %v799_v20, %v795_v24 }
 0x195   : > { %v717_v37 = vpop.f32.mrf.mxu2  ;;  %v806_v60 = vmax.f32 %v1869_v44, 0.0 }
 0x196   : > { %v736_v41 = vpop.f32.mrf.mxu3  ;;  %v823_v5 = vpack.c.bf16 %v805_v53, %v801_v38  ;;  %v751_v7 = vadd.f32 %v717_v37, %v624_v62  ;;  %v820_v62 = vpack.c.bf16 %v798_v2, %v794_v11 }
 0x197   : > { %v824_v6 = vpack.c.bf16 %v806_v60, %v802_v42  ;;  %v752_v12 = vadd.f32 %v736_v41, %v625_v63 }
 0x198   : > { %849 = vmatpush.bf16.msra.mxu0 %v823_v5  ;;  %v1911_v63 = vadd.f32 %v770_v21, %v751_v7 }
 0x199   : > { %868 = vmatpush.bf16.msra.mxu1 %v824_v6  ;;  %v1916_v15 = vadd.f32 %v770_v21, %v752_v12  ;;  %v800_v21 = vmax.f32 %v1924_v8, 0.0  ;;  %v943_v52 = vpop.permute.xlu2 %942 }
 0x19a   : > { %v803_v56 = vmax.f32 %v1911_v63, 0.0 }
 0x19b   : > { %v804_v57 = vmax.f32 %v1916_v15, 0.0  ;;  %v822_v29 = vpack.c.bf16 %v800_v21, %v796_v25 }
 0x19c   : > { %850 = vmatpush.bf16.msra.mxu0 %v819_v50 }
 0x19d   : > { %v719_v55 = vpop.f32.mrf.mxu2  ;;  %869 = vmatpush.bf16.msra.mxu1 %v820_v62 }
 0x19e   : > { %v738_v3 = vpop.f32.mrf.mxu3  ;;  %v755_v16 = vadd.f32 %v719_v55, %v628_v0 }
 0x19f   : > { %v756_v58 = vadd.f32 %v738_v3, %v629_v1  ;;  %1360 = vmatmul.msk.bf16.vlgmr.msra.gmra.mxu0 %vm658_vm1, %v1421_v4 }
 0x1a0   : > { %v1926_v9 = vadd.f32 %v775_v39, %v755_v16  ;;  %1362 = vmatmul.msk.bf16.vlgmr.msra.gmra.mxu1 %vm658_vm1, %v1421_v4 }
 0x1a1   : > { %v1928_v17 = vadd.f32 %v775_v39, %v756_v58 }
 0x1a2   : > { %v807_v0 = vmax.f32 %v1926_v9, 0.0 }
 0x1a3   : > { %v808_v1 = vmax.f32 %v1928_v17, 0.0 }
 0x1a4   : > { %v825_v22 = vpack.c.bf16 %v807_v0, %v803_v56 }
 0x1a5   : > { %v826_v23 = vpack.c.bf16 %v808_v1, %v804_v57 }
 0x1a6   : > { %887 = vmatpush.bf16.msra.mxu2 %v825_v22 }
 0x1a7   : > { %906 = vmatpush.bf16.msra.mxu3 %v826_v23 }
 0x1aa   : > { %888 = vmatpush.bf16.msra.mxu2 %v821_v26 }
 0x1ab   : > { %907 = vmatpush.bf16.msra.mxu3 %v822_v29  ;;  %v1423_v29 = vld [vmem:[%s2056_s1 + $0x30] sm:$0xff] }
 0x1ad   : > { %1364 = vmatmul.msk.bf16.vlgmr.msra.gmra.mxu2 %vm658_vm1, %v1421_v4 }
 0x1ae   : > { %1366 = vmatmul.msk.bf16.vlgmr.msra.gmra.mxu3 %vm658_vm1, %v1421_v4 }
 0x1af   : > { %1361 = vmatmul.msk.bf16.gmra.mxu0 %vm658_vm1, %v1422_v30 }
 0x1b0   : > { %1363 = vmatmul.msk.bf16.gmra.mxu1 %vm658_vm1, %v1422_v30 }
 0x1bd   : > { %1365 = vmatmul.msk.bf16.gmra.mxu2 %vm658_vm1, %v1422_v30 }
 0x1be   : > { %1367 = vmatmul.msk.bf16.gmra.mxu3 %vm658_vm1, %v1422_v30 }
 0x21c   : > { %v852_v33 = vpop.f32.mrf.mxu0 }
 0x21d   : > { %v871_v34 = vpop.f32.mrf.mxu1  ;;  %v919_v6 = vadd.f32 %v852_v33, %v793_v10 }
 0x21e   : > { %v920_v7 = vadd.f32 %v871_v34, %v794_v11 }
 0x224   : > { %v854_v47 = vpop.f32.mrf.mxu0 }
 0x225   : > { %v873_v48 = vpop.f32.mrf.mxu1  ;;  %v923_v41 = vadd.f32 %v854_v47, %v797_v61  ;;  %v938_v61 = vpop.permute.xlu1 %937 }
 0x226   : > { %v924_v5 = vadd.f32 %v873_v48, %v798_v2  ;;  %v955_v11 = vadd.f32 %v938_v61, %v919_v6  ;;  %v956_v62 = vadd.f32 %v938_v61, %v920_v7  ;;  %v1004_v6 = vpop.permute.xlu0 %1003 }
 0x227   : > { %v959_v45 = vadd.f32 %v943_v52, %v923_v41 }
 0x228   : > { %v960_v2 = vadd.f32 %v943_v52, %v924_v5  ;;  %v971_v58 = vmax.f32 %v955_v11, 0.0  ;;  %v972_v44 = vmax.f32 %v956_v62, 0.0 }
 0x229   : > { %v975_v4 = vmax.f32 %v959_v45, 0.0 }
 0x22a   : > { %v976_v16 = vmax.f32 %v960_v2, 0.0 }
 0x22b   : > { %v993_v23 = vpack.c.bf16 %v975_v4, %v971_v58 }
 0x22c   : > { %v857_v28 = vpop.f32.mrf.mxu0  ;;  %v994_v26 = vpack.c.bf16 %v976_v16, %v972_v44 }
 0x22d   : > { %v876_v35 = vpop.f32.mrf.mxu1  ;;  %v927_v40 = vadd.f32 %v857_v28, %v801_v38 }
 0x22e   : > { %v928_v37 = vadd.f32 %v876_v35, %v802_v42 }
 0x22f   : > { %v963_v38 = vadd.f32 %v948_v49, %v927_v40 }
 0x230   : > { %v890_v36 = vpop.f32.mrf.mxu2  ;;  %v964_v50 = vadd.f32 %v948_v49, %v928_v37 }
 0x231   : > { %v909_v39 = vpop.f32.mrf.mxu3  ;;  %v979_v51 = vmax.f32 %v963_v38, 0.0  ;;  %v921_v48 = vadd.f32 %v890_v36, %v795_v24 }
 0x232   : > { %v980_v54 = vmax.f32 %v964_v50, 0.0  ;;  %v922_v63 = vadd.f32 %v909_v39, %v796_v25 }
 0x233   : > { %v957_v37 = vadd.f32 %v938_v61, %v921_v48 }
 0x234   : > { %v859_v12 = vpop.f32.mrf.mxu0  ;;  %v958_v18 = vadd.f32 %v938_v61, %v922_v63 }
 0x235   : > { %v878_v13 = vpop.f32.mrf.mxu1  ;;  %v931_v27 = vadd.f32 %v859_v12, %v805_v53  ;;  %v973_v9 = vmax.f32 %v957_v37, 0.0 }
 0x236   : > { %v932_v31 = vadd.f32 %v878_v13, %v806_v60 }
 0x237   : > { %v967_v10 = vadd.f32 %v953_v14, %v931_v27 }
 0x238   : > { %v892_v43 = vpop.f32.mrf.mxu2  ;;  %v968_v46 = vadd.f32 %v953_v14, %v932_v31 }
 0x239   : > { %v911_v42 = vpop.f32.mrf.mxu3  ;;  %v983_v55 = vmax.f32 %v967_v10, 0.0  ;;  %v925_v34 = vadd.f32 %v892_v43, %v799_v20 }
 0x23a   : > { %v984_v3 = vmax.f32 %v968_v46, 0.0  ;;  %v926_v47 = vadd.f32 %v911_v42, %v800_v21 }
 0x23b   : > { %v997_v32 = vpack.c.bf16 %v983_v55, %v979_v51  ;;  %v961_v20 = vadd.f32 %v943_v52, %v925_v34 }
 0x23c   : > { %v998_v53 = vpack.c.bf16 %v984_v3, %v980_v54  ;;  %v962_v40 = vadd.f32 %v943_v52, %v926_v47  ;;  %v1009_v52 = vpop.permute.xlu1 %1008 }
 0x23d   : > { %1025 = vmatpush.bf16.msrb.mxu0 %v997_v32  ;;  %v977_v39 = vmax.f32 %v961_v20, 0.0 }
 0x23e   : > { %1039 = vmatpush.bf16.msrb.mxu1 %v998_v53  ;;  %v978_v41 = vmax.f32 %v962_v40, 0.0 }
 0x23f   : > { %v995_v17 = vpack.c.bf16 %v977_v39, %v973_v9 }
 0x240   : > { %v895_v60 = vpop.f32.mrf.mxu2 }
 0x241   : > { %v914_v22 = vpop.f32.mrf.mxu3  ;;  %1026 = vmatpush.bf16.msrb.mxu0 %v993_v23  ;;  %v929_v30 = vadd.f32 %v895_v60, %v803_v56 }
 0x242   : > { %1040 = vmatpush.bf16.msrb.mxu1 %v994_v26  ;;  %v930_v33 = vadd.f32 %v914_v22, %v804_v57 }
 0x243   : > { %v965_v15 = vadd.f32 %v948_v49, %v929_v30 }
 0x244   : > { %1376 = vmatmul.msk.bf16.vlgmr.msrb.gmra.mxu0 %vm658_vm1, %v1423_v29  ;;  %v966_v57 = vadd.f32 %v948_v49, %v930_v33 }
 0x245   : > { %1377 = vmatmul.msk.bf16.vlgmr.msrb.gmra.mxu1 %vm658_vm1, %v1423_v29  ;;  %v981_v24 = vmax.f32 %v965_v15, 0.0 }
 0x246   : > { %v982_v36 = vmax.f32 %v966_v57, 0.0 }
 0x248   : > { %v897_v56 = vpop.f32.mrf.mxu2 }
 0x249   : > { %v916_v28 = vpop.f32.mrf.mxu3  ;;  %v933_v35 = vadd.f32 %v897_v56, %v807_v0  ;;  %v974_v0 = vmax.f32 %v958_v18, 0.0 }
 0x24a   : > { %v934_v59 = vadd.f32 %v916_v28, %v808_v1 }
 0x24b   : > { %v969_v8 = vadd.f32 %v953_v14, %v933_v35  ;;  %v996_v1 = vpack.c.bf16 %v978_v41, %v974_v0 }
 0x24c   : > { %v970_v21 = vadd.f32 %v953_v14, %v934_v59 }
 0x24d   : > { %v985_v19 = vmax.f32 %v969_v8, 0.0 }
 0x24e   : > { %v986_v25 = vmax.f32 %v970_v21, 0.0 }
 0x24f   : > { %v999_v49 = vpack.c.bf16 %v985_v19, %v981_v24 }
 0x250   : > { %v1000_v5 = vpack.c.bf16 %v986_v25, %v982_v36 }
 0x251   : > { %1053 = vmatpush.bf16.msrb.mxu2 %v999_v49 }
 0x252   : > { %1067 = vmatpush.bf16.msrb.mxu3 %v1000_v5 }
 0x255   : > { %1054 = vmatpush.bf16.msrb.mxu2 %v995_v17 }
 0x256   : > { %1068 = vmatpush.bf16.msrb.mxu3 %v996_v1 }
 0x258   : > { %1378 = vmatmul.msk.bf16.vlgmr.msrb.gmra.mxu2 %vm658_vm1, %v1423_v29 }
 0x259   : > { %1379 = vmatmul.msk.bf16.vlgmr.msrb.gmra.mxu3 %vm658_vm1, %v1423_v29 }
 0x2c1   : > { %v1028_v7 = vpop.f32.mrf.mxu0 }
 0x2c2   : > { %v1042_v12 = vpop.f32.mrf.mxu1  ;;  %v1029_v13 = vadd.f32 %v1028_v7, %v1004_v6 }
 0x2c3   : > { %v1043_v14 = vadd.f32 %v1042_v12, %v1004_v6 }
 0x2c4   : > { %1471 = vtanh.f32 %v1029_v13 }
 0x2c5   : > { %1473 = vtanh.f32 %v1043_v14 }
 0x2c9   : > { %v1030_v38 = vpop.f32.mrf.mxu0 }
 0x2ca   : > { %v1044_v50 = vpop.f32.mrf.mxu1  ;;  %v1472_v27 = vpop.eup %1471  ;;  %v1031_v31 = vadd.f32 %v1030_v38, %v1009_v52 }
 0x2cb   : > { %v1045_v43 = vadd.f32 %v1044_v50, %v1009_v52  ;;  %v1474_v42 = vpop.eup %1473  ;;  %1083 = vst [vmem:[%s2011_s10] sm:$0xff] %v1472_v27 }
 0x2cc   : > { %1084 = vst [vmem:[%s2011_s10 + $0x8] sm:$0xff] %v1474_v42  ;;  %1475 = vtanh.f32 %v1031_v31 }
 0x2cd   : > { %1477 = vtanh.f32 %v1045_v43 }
 0x2d2   : > { %v1476_v61 = vpop.eup %1475 }
 0x2d3   : > { %v1478_v45 = vpop.eup %1477  ;;  %1087 = vst [vmem:[%s2011_s10 + $0x20] sm:$0xff] %v1476_v61 }
 0x2d4   : > { %1088 = vst [vmem:[%s2011_s10 + $0x28] sm:$0xff] %v1478_v45 }
 0x2db   : > { %v1056_v2 = vpop.f32.mrf.mxu2 }
 0x2dc   : > { %v1070_v10 = vpop.f32.mrf.mxu3  ;;  %v1057_v46 = vadd.f32 %v1056_v2, %v1004_v6 }
 0x2dd   : > { %v1071_v11 = vadd.f32 %v1070_v10, %v1004_v6 }
 0x2de   : > { %1479 = vtanh.f32 %v1057_v46 }
 0x2df   : > { %1481 = vtanh.f32 %v1071_v11 }
 0x2e3   : > { %v1058_v62 = vpop.f32.mrf.mxu2 }
 0x2e4   : > { %v1072_v51 = vpop.f32.mrf.mxu3  ;;  %v1480_v54 = vpop.eup %1479  ;;  %v1059_v55 = vadd.f32 %v1058_v62, %v1009_v52 }
 0x2e5   : > { %v1073_v3 = vadd.f32 %v1072_v51, %v1009_v52  ;;  %v1482_v4 = vpop.eup %1481  ;;  %1085 = vst [vmem:[%s2011_s10 + $0x10] sm:$0xff] %v1480_v54 }
 0x2e6   : > { %1086 = vst [vmem:[%s2011_s10 + $0x18] sm:$0xff] %v1482_v4  ;;  %1483 = vtanh.f32 %v1059_v55 }
 0x2e7   : > { %1485 = vtanh.f32 %v1073_v3 }
 0x2ec   : > { %v1484_v16 = vpop.eup %1483 }
 0x2ed   : > { %v1486_v32 = vpop.eup %1485  ;;  %1089 = vst [vmem:[%s2011_s10 + $0x30] sm:$0xff] %v1484_v16 }
 0x2ee   : > { %1090 = vst [vmem:[%s2011_s10 + $0x38] sm:$0xff] %v1486_v32 }
 0x2ef   : > { %1514 = shalt.err (!%p1511_p3)
}
 0x2f0   : > { %s1552_s6 = smov 512   ;;  %s1553_s7 = smov 1024  }
 0x2f1   : > { %s1554_s8 = smov 32  }
 0x2f2   : > { %1425 = dma.vmem_to_hbm [thread:$0]  (%p1613_p5), %s1105_s24, 1024, %s1107_s16, %s1092_s25, %s1552_s6, %s1553_s7, %s1554_s8  }
 0x2f3 PF: > { %p1431_p4 = scmp.ge.s32.totalorder %s1549_s15, 2  ;;  %s1121_s9 = sand.u32 1, %s1537_s12  }
 0x2f4   : > { %s1122_s10 = scalar_lea.sflag [#allocation3], %s1121_s9 }
 0x2f5   : > { %p1428_p7 = pnand %p1431_p4, %p1617_p6 }
 0x2f7   : > { %p1429_p8 = pneg %p1428_p7 }
 0x2f9   : > { %1532 = dma.done.wait (%p1429_p8), %s1122_s10, 1024  }
 0x2fa   : > { %1534 = vsyncadd (%p1429_p8), %s1122_s10, 4294966272  ;;  %p13_p9 = scmp.ge.s32.totalorder %s1600_s18, 4   ;;  %s2061_s12 = smov %s1541_s13 }
 0x2fb   : > { %s2062_s13 = smov %s1545_s14  ;;  %s2063_s14 = smov %s1611_s21 }
 0x2fc   : > { %s2064_s15 = smov %s1600_s18  ;;  %15 = sbr.rel (!%p13_p9) target bundleno = 3 (0x3), region = 73 }
 0x301   :  { %1128 = vsyncpa [#allocation3], 1 }
 0x302   :  { %1130 = vsyncpa [#allocation3 + $0x1], 1 }

</bundles_post_ra>
